<compile_context>
chip_gen: v5e
topology: v5e:2x2
jax: 0.10.0
libtpu: 0.0.40
codegen_flags: <defaults>
</compile_context>

<pallas_src>
import numpy as np
import jax
import jax.numpy as jnp
from jax.experimental import pallas as pl
from jax.experimental.pallas import tpu as pltpu

EPS = 1e-5


# ----------------------------------------------------------------------------
# VMEM budget / tile sizing (per-generation: 128 MiB on v5e/v6e, 64 MiB on v7x)
# ----------------------------------------------------------------------------
def _vmem_budget_bytes():
    cap = 64 * 1024 * 1024  # conservative fallback (v7x physical VMEM)
    try:
        cap = int(getattr(pltpu.get_tpu_info(), "vmem_capacity_bytes", cap))
    except Exception:
        pass
    return (cap * 3) // 4


def _choose_row_tile(Hout, Wout, cins, Cout, out_dtype, budget):
    """Largest TH dividing Hout whose per-step VMEM footprint fits the budget."""
    out_b = jnp.dtype(out_dtype).itemsize
    best = 1
    for th in range(1, Hout + 1):
        if Hout % th:
            continue
        est = 2 * th * Wout * Cout * out_b          # double-buffered output block
        est += th * Wout * Cout * 4                 # f32 accumulator scratch
        for c in cins:
            est += 2 * th * Wout * c * 2            # double-buffered bf16 body block
            est += (th + 2) * (Wout + 2) * c * 4    # f32 padded slab scratch
            est += 2 * Wout * c * 2                 # halo-row staging buffer
            est += 2 * 3 * 3 * c * Cout * 2         # weights
            est += th * Wout * 3 * c * (4 + 4 + 2)  # patch temporaries
        if est <= budget:
            best = th
    return best


# ----------------------------------------------------------------------------
# Pallas kernels
# ----------------------------------------------------------------------------
def upconv_kernel(x_ref, w_ref, b_ref, o_ref):
    # x_ref: (TM, Cin) bf16   w_ref: (Cin, 4*Cout) bf16   b_ref: (1, 4*Cout) f32
    acc = jnp.dot(x_ref[...], w_ref[...], preferred_element_type=jnp.float32)
    o_ref[...] = (acc + b_ref[...]).astype(o_ref.dtype)


def _make_conv_kernel(num_srcs, TH, Wout, cins, Cout, n_row_tiles, Hout):
    """3x3 conv (+ folded BN + ReLU) over `num_srcs` channel-split inputs.

    refs layout:
      inputs : [body blocks x S] [HBM refs x S] [weights x S] scale shift
      outputs: out
      scratch: [padded slabs x S] [halo buffers x S] acc sems
    """

    def kernel(*refs):
        blks = refs[0:num_srcs]                       # (TH, Wout, Cin) bf16 (pipelined)
        hbms = refs[num_srcs:2 * num_srcs]            # (N, Hout, Wout, Cin) bf16, HBM
        ws = refs[2 * num_srcs:3 * num_srcs]          # (3, 3*Cin, Cout) bf16
        scale_ref = refs[3 * num_srcs]                # (1, Cout) f32
        shift_ref = refs[3 * num_srcs + 1]            # (1, Cout) f32
        out_ref = refs[3 * num_srcs + 2]              # (TH, Wout, Cout)
        xpads = refs[3 * num_srcs + 3:4 * num_srcs + 3]   # (TH+2, Wout+2, Cin) f32
        halos = refs[4 * num_srcs + 3:5 * num_srcs + 3]   # (2, Wout, Cin) bf16
        acc_ref = refs[5 * num_srcs + 3]              # (TH*Wout, Cout) f32
        sems = refs[5 * num_srcs + 4]                 # DMA sems (2*num_srcs,)

        n = pl.program_id(0)
        i = pl.program_id(1)
        r_top = jnp.maximum(i * TH - 1, 0)            # clamped halo source rows
        r_bot = jnp.minimum(i * TH + TH, Hout - 1)

        # Kick off the (tiny) halo-row DMAs first so they overlap the body copy.
        copies = []
        for s in range(num_srcs):
            ct = pltpu.make_async_copy(hbms[s].at[n, r_top, :, :],
                                       halos[s].at[0], sems.at[2 * s])
            cb = pltpu.make_async_copy(hbms[s].at[n, r_bot, :, :],
                                       halos[s].at[1], sems.at[2 * s + 1])
            ct.start()
            cb.start()
            copies.extend((ct, cb))

        # Build the zero-padded (TH+2, Wout+2, Cin) slab: W borders zero, body
        # from the pipelined block.
        for s in range(num_srcs):
            c = cins[s]
            zcol = jnp.zeros((TH + 2, 1, c), jnp.float32)
            xpads[s][:, 0:1, :] = zcol
            xpads[s][:, Wout + 1:Wout + 2, :] = zcol
            xpads[s][1:TH + 1, 1:Wout + 1, :] = blks[s][...].astype(jnp.float32)

        for cp in copies:
            cp.wait()

        # H halo rows: real neighbor rows in the interior, zeros at the image edge.
        keep_top = (i > 0).astype(jnp.float32)
        keep_bot = (i < n_row_tiles - 1).astype(jnp.float32)
        for s in range(num_srcs):
            top = halos[s][0:1, :, :].astype(jnp.float32) * keep_top
            bot = halos[s][1:2, :, :].astype(jnp.float32) * keep_bot
            xpads[s][0:1, 1:Wout + 1, :] = top
            xpads[s][TH + 1:TH + 2, 1:Wout + 1, :] = bot

        # 3x3 conv as 3 deep-K (K = 3*Cin) bf16 MXU matmuls per source, f32 accum.
        acc_ref[...] = jnp.zeros_like(acc_ref)
        for s in range(num_srcs):
            c = cins[s]
            for dy in range(3):
                rows = xpads[s][dy:dy + TH, :, :]               # (TH, Wout+2, c)
                patch = jnp.concatenate(
                    [rows[:, 0:Wout, :],
                     rows[:, 1:Wout + 1, :],
                     rows[:, 2:Wout + 2, :]], axis=-1)          # (TH, Wout, 3c)
                patch = patch.reshape(TH * Wout, 3 * c).astype(jnp.bfloat16)
                acc_ref[...] += jnp.dot(patch, ws[s][dy],
                                        preferred_element_type=jnp.float32)

        # Folded BatchNorm (+ conv bias) affine and ReLU, f32 epilogue.
        y = jnp.maximum(acc_ref[...] * scale_ref[...] + shift_ref[...], 0.0)
        out_ref[...] = y.reshape(TH, Wout, Cout).astype(out_ref.dtype)

    return kernel


# ----------------------------------------------------------------------------
# Wrappers
# ----------------------------------------------------------------------------
def conv3x3_bn_relu(srcs, ws, scale, shift, out_dtype, row_tile=None):
    """Fused 3x3 conv over channel-split sources + folded BN + ReLU (NHWC)."""
    N, Hout, Wout, _ = srcs[0].shape
    cins = [int(s.shape[-1]) for s in srcs]
    Cout = int(ws[0].shape[-1])
    S = len(srcs)
    budget = _vmem_budget_bytes()
    TH = int(row_tile) if row_tile is not None else _choose_row_tile(
        Hout, Wout, cins, Cout, out_dtype, budget)
    assert Hout % TH == 0, (Hout, TH)
    nrt = Hout // TH

    kernel = _make_conv_kernel(S, TH, Wout, cins, Cout, nrt, Hout)

    blk_specs = [pl.BlockSpec((None, TH, Wout, c), lambda n, i: (n, i, 0, 0))
                 for c in cins]
    any_specs = [pl.BlockSpec(memory_space=pl.ANY) for _ in srcs]
    w_specs = [pl.BlockSpec((3, 3 * c, Cout), lambda n, i: (0, 0, 0))
               for c in cins]
    vec_spec = pl.BlockSpec((1, Cout), lambda n, i: (0, 0))

    scratch = (
        [pltpu.VMEM((TH + 2, Wout + 2, c), jnp.float32) for c in cins]
        + [pltpu.VMEM((2, Wout, c), srcs[s].dtype) for s, c in enumerate(cins)]
        + [pltpu.VMEM((TH * Wout, Cout), jnp.float32),
           pltpu.SemaphoreType.DMA((2 * S,))]
    )

    return pl.pallas_call(
        kernel,
        out_shape=jax.ShapeDtypeStruct((N, Hout, Wout, Cout), out_dtype),
        grid=(N, nrt),
        in_specs=blk_specs + any_specs + w_specs + [vec_spec, vec_spec],
        out_specs=pl.BlockSpec((None, TH, Wout, Cout), lambda n, i: (n, i, 0, 0)),
        scratch_shapes=scratch,
        compiler_params=pltpu.CompilerParams(
            dimension_semantics=("parallel", "parallel"),
            vmem_limit_bytes=int(budget)),
    )(*srcs, *srcs, *ws, scale, shift)


def decoder_block_forward(x_nchw, skip_nchw, params, row_tile=None):
    # x_nchw: (N, in_c, H, W); skip_nchw: (N, out_c, 2H, 2W) -> (N, out_c, 2H, 2W)
    x = jnp.transpose(x_nchw, (0, 2, 3, 1)).astype(jnp.bfloat16)       # NHWC bf16
    skip = jnp.transpose(skip_nchw, (0, 2, 3, 1)).astype(jnp.bfloat16)
    N, H, W, Cin = x.shape
    Cout = int(params["bt_mat"].shape[1]) // 4
    budget = _vmem_budget_bytes()

    # --- ConvTranspose2d(k=2,s=2): per-input-pixel matmul Cin -> (2,2,Cout) ---
    M = N * H * W
    TM = M if M <= 1024 else 1024
    x_mat = x.reshape(M, Cin)
    up_mat = pl.pallas_call(
        upconv_kernel,
        out_shape=jax.ShapeDtypeStruct((M, 4 * Cout), jnp.bfloat16),
        grid=(pl.cdiv(M, TM),),
        in_specs=[pl.BlockSpec((TM, Cin), lambda i: (i, 0)),
                  pl.BlockSpec((Cin, 4 * Cout), lambda i: (0, 0)),
                  pl.BlockSpec((1, 4 * Cout), lambda i: (0, 0))],
        out_specs=pl.BlockSpec((TM, 4 * Cout), lambda i: (i, 0)),
        compiler_params=pltpu.CompilerParams(
            dimension_semantics=("parallel",),
            vmem_limit_bytes=int(budget)),
    )(x_mat, params["wt_mat"], params["bt_mat"])

    # glue: interleave the 2x2 sub-pixels -> (N, 2H, 2W, Cout) (kept bf16)
    up = (up_mat.reshape(N, H, W, 2, 2, Cout)
          .transpose(0, 1, 3, 2, 4, 5)
          .reshape(N, 2 * H, 2 * W, Cout))

    # conv1 over the "concat" is done by channel-split weights: conv(up)+conv(skip)
    h1 = conv3x3_bn_relu([up, skip], [params["w1k_up"], params["w1k_sk"]],
                         params["s1"], params["sh1"],
                         out_dtype=jnp.bfloat16, row_tile=row_tile)
    out = conv3x3_bn_relu([h1], [params["w2k"]],
                          params["s2"], params["sh2"],
                          out_dtype=jnp.float32, row_tile=row_tile)
    return jnp.transpose(out, (0, 3, 1, 2))  # back to NCHW


# ----------------------------------------------------------------------------
# Deterministic parameter init (PyTorch shapes), converted to kernel layouts
# ----------------------------------------------------------------------------
def init_params(key, in_c, out_c):
    ks = jax.random.split(key, 14)
    p = {}
    # ConvTranspose2d(in_c, out_c, 2, 2): weight (in_c, out_c, 2, 2), bias (out_c,)
    wt = 0.1 * jax.random.normal(ks[0], (in_c, out_c, 2, 2), jnp.float32)
    bt = 0.1 * jax.random.normal(ks[1], (out_c,), jnp.float32)
    # conv1: Conv2d(2*out_c, out_c, 3, padding=1)
    w1 = 0.1 * jax.random.normal(ks[2], (out_c, 2 * out_c, 3, 3), jnp.float32)
    b1 = 0.1 * jax.random.normal(ks[3], (out_c,), jnp.float32)
    g1 = 1.0 + 0.1 * jax.random.normal(ks[4], (out_c,), jnp.float32)
    be1 = 0.1 * jax.random.normal(ks[5], (out_c,), jnp.float32)
    m1 = 0.1 * jax.random.normal(ks[6], (out_c,), jnp.float32)
    v1 = jax.random.uniform(ks[7], (out_c,), jnp.float32, 0.5, 1.5)
    # conv2: Conv2d(out_c, out_c, 3, padding=1)
    w2 = 0.1 * jax.random.normal(ks[8], (out_c, out_c, 3, 3), jnp.float32)
    b2 = 0.1 * jax.random.normal(ks[9], (out_c,), jnp.float32)
    g2 = 1.0 + 0.1 * jax.random.normal(ks[10], (out_c,), jnp.float32)
    be2 = 0.1 * jax.random.normal(ks[11], (out_c,), jnp.float32)
    m2 = 0.1 * jax.random.normal(ks[12], (out_c,), jnp.float32)
    v2 = jax.random.uniform(ks[13], (out_c,), jnp.float32, 0.5, 1.5)

    # transposed-conv weight as a (Cin, 4*Cout) matmul, columns ordered (dy, dx, co)
    p["wt_mat"] = jnp.transpose(wt, (0, 2, 3, 1)).reshape(in_c, 4 * out_c).astype(jnp.bfloat16)
    p["bt_mat"] = jnp.tile(bt, 4).reshape(1, 4 * out_c)  # f32
    # conv1 weight split along its input channels (up half / skip half),
    # reshaped for deep-K dots: (kh, 3*Cin, Cout) with (kw, ci) flattened.
    w1_up = w1[:, :out_c, :, :]
    w1_sk = w1[:, out_c:, :, :]
    p["w1k_up"] = jnp.transpose(w1_up, (2, 3, 1, 0)).reshape(3, 3 * out_c, out_c).astype(jnp.bfloat16)
    p["w1k_sk"] = jnp.transpose(w1_sk, (2, 3, 1, 0)).reshape(3, 3 * out_c, out_c).astype(jnp.bfloat16)
    p["w2k"] = jnp.transpose(w2, (2, 3, 1, 0)).reshape(3, 3 * out_c, out_c).astype(jnp.bfloat16)
    # fold eval-mode BatchNorm (+ conv bias) into per-channel scale/shift (f32)
    s1 = g1 / jnp.sqrt(v1 + EPS)
    s2 = g2 / jnp.sqrt(v2 + EPS)
    p["s1"] = s1.reshape(1, out_c)
    p["sh1"] = (be1 + s1 * (b1 - m1)).reshape(1, out_c)
    p["s2"] = s2.reshape(1, out_c)
    p["sh2"] = (be2 + s2 * (b2 - m2)).reshape(1, out_c)
    # raw params kept for the pure-JAX reference
    p["raw"] = (wt, bt, w1, b1, (g1, be1, m1, v1), w2, b2, (g2, be2, m2, v2))
    return p


# ----------------------------------------------------------------------------
# Pure-JAX reference (f32, for correctness sanity check)
# ----------------------------------------------------------------------------
def reference_forward(x_nchw, skip_nchw, params):
    wt, bt, w1, b1, bn1, w2, b2, bn2 = params["raw"]
    x = jnp.transpose(x_nchw, (0, 2, 3, 1)).astype(jnp.float32)
    skip = jnp.transpose(skip_nchw, (0, 2, 3, 1)).astype(jnp.float32)
    N, H, W, Cin = x.shape
    Cout = wt.shape[1]
    up = jnp.einsum("nhwc,coij->nhiwjo", x, wt,
                    precision=jax.lax.Precision.HIGHEST) + bt
    up = up.reshape(N, 2 * H, 2 * W, Cout)
    cat = jnp.concatenate([up, skip], axis=-1)

    def conv_bn_relu(z, w, b, bn):
        g, be, m, v = bn
        w_hwio = jnp.transpose(w, (2, 3, 1, 0))
        y = jax.lax.conv_general_dilated(
            z, w_hwio, window_strides=(1, 1), padding=((1, 1), (1, 1)),
            dimension_numbers=("NHWC", "HWIO", "NHWC"),
            precision=jax.lax.Precision.HIGHEST,
        ) + b
        y = g * (y - m) / jnp.sqrt(v + EPS) + be
        return jnp.maximum(y, 0.0)

    h = conv_bn_relu(cat, w1, b1, bn1)
    out = conv_bn_relu(h, w2, b2, bn2)
    return jnp.transpose(out, (0, 3, 1, 2))


# ----------------------------------------------------------------------------
if __name__ == "__main__":
    key = jax.random.PRNGKey(0)
    k_x, k_s, k_p = jax.random.split(key, 3)

    N, in_c, out_c, H, W = 2, 8, 4, 8, 8
    x = jax.random.normal(k_x, (N, in_c, H, W), jnp.float32)               # NCHW
    skip = jax.random.normal(k_s, (N, out_c, 2 * H, 2 * W), jnp.float32)   # NCHW
    params = init_params(k_p, in_c, out_c)

    ref = jax.block_until_ready(reference_forward(x, skip, params))

    # auto-sized row tiles (single tile at this toy size)
    out_auto = jax.block_until_ready(decoder_block_forward(x, skip, params))
    # forced small row tile to exercise the multi-tile halo path
    out_tiled = jax.block_until_ready(decoder_block_forward(x, skip, params, row_tile=4))

    np.testing.assert_allclose(np.asarray(out_auto), np.asarray(ref),
                               rtol=5e-2, atol=5e-2)
    np.testing.assert_allclose(np.asarray(out_tiled), np.asarray(ref),
                               rtol=5e-2, atol=5e-2)
    assert out_auto.shape == (N, out_c, 2 * H, 2 * W)
    print("KERNEL_OK")
</pallas_src>

<mosaic_0001>
module attributes {stable_mosaic.version = 11 : i64} {
  func.func @upconv_kernel(%arg0: i32, %arg1: memref<128x8xbf16, #tpu.memory_space<vmem>>, %arg2: memref<8x16xbf16, #tpu.memory_space<vmem>>, %arg3: memref<1x16xf32, #tpu.memory_space<vmem>>, %arg4: memref<128x16xbf16, #tpu.memory_space<vmem>>) attributes {dimension_semantics = [#tpu.dimension_semantics<parallel>], iteration_bounds = array<i64: 1>, scalar_prefetch = 0 : i64, scratch_operands = 0 : i64, tpu.core_type = #tpu.core_type<tc>, window_params = [{transform_indices = @transform_0, window_bounds = array<i64: 128, 8>}, {pipeline_mode = #tpu.pipeline_mode<synchronous>, transform_indices = @transform_1, window_bounds = array<i64: 8, 16>}, {pipeline_mode = #tpu.pipeline_mode<synchronous>, transform_indices = @transform_2, window_bounds = array<i64: 1, 16>}, {transform_indices = @transform_3, window_bounds = array<i64: 128, 16>}]} {
    %c0 = arith.constant 0 : index
    %c0_0 = arith.constant 0 : index
    %0 = vector.load %arg1[%c0, %c0_0] : memref<128x8xbf16, #tpu.memory_space<vmem>>, vector<128x8xbf16>
    %c0_1 = arith.constant 0 : index
    %c0_2 = arith.constant 0 : index
    %1 = vector.load %arg2[%c0_1, %c0_2] : memref<8x16xbf16, #tpu.memory_space<vmem>>, vector<8x16xbf16>
    %cst = arith.constant dense<0.000000e+00> : vector<128x16xf32>
    %2 = tpu.matmul %0, %1, %cst {dimension_numbers = #tpu.dot_dimension_numbers<[1], [0], [0], [1], [0, 0, 1, 1], [], []>} : vector<128x8xbf16>, vector<8x16xbf16>, vector<128x16xf32> -> vector<128x16xf32>
    %c0_3 = arith.constant 0 : index
    %c0_4 = arith.constant 0 : index
    %3 = vector.load %arg3[%c0_3, %c0_4] : memref<1x16xf32, #tpu.memory_space<vmem>>, vector<1x16xf32>
    %4 = vector.broadcast %3 : vector<1x16xf32> to vector<128x16xf32>
    %5 = arith.addf %2, %4 : vector<128x16xf32>
    %6 = arith.truncf %5 : vector<128x16xf32> to vector<128x16xbf16>
    %c0_5 = arith.constant 0 : index
    %c0_6 = arith.constant 0 : index
    %7 = vector.load %arg4[%c0_5, %c0_6] : memref<128x16xbf16, #tpu.memory_space<vmem>>, vector<128x16xbf16>
    tpu.vector_store %arg4[%c0_5, %c0_6], %6 {strides = array<i32>} : memref<128x16xbf16, #tpu.memory_space<vmem>>, vector<128x16xbf16>,
    return
  }
  func.func @transform_0(%arg0: i32) -> (i32, i32) {
    %c0_i32 = arith.constant 0 : i32
    %c0_i32_0 = arith.constant 0 : i32
    return %arg0, %c0_i32 : i32, i32
  }
  func.func @transform_1(%arg0: i32) -> (i32, i32) {
    %c0_i32 = arith.constant 0 : i32
    %c0_i32_0 = arith.constant 0 : i32
    %c0_i32_1 = arith.constant 0 : i32
    return %c0_i32, %c0_i32_0 : i32, i32
  }
  func.func @transform_2(%arg0: i32) -> (i32, i32) {
    %c0_i32 = arith.constant 0 : i32
    %c0_i32_0 = arith.constant 0 : i32
    %c0_i32_1 = arith.constant 0 : i32
    return %c0_i32, %c0_i32_0 : i32, i32
  }
  func.func @transform_3(%arg0: i32) -> (i32, i32) {
    %c0_i32 = arith.constant 0 : i32
    %c0_i32_0 = arith.constant 0 : i32
    return %arg0, %c0_i32 : i32, i32
  }
}

</mosaic_0001>

<bundles_post_ra>
// kernel: tpu_custom_call.1
= control target key start
LH: loop header
LB: loop body
LE: loop exit
PB: predicated region body
PF: predicated region fallthrough
CT: control target
= control target key end

     0   :  { %vm101_vm0 = vcmask 1043456   ;;  %vm76_vm1 = vcmask 64512   ;;  %vm170_vm2 = vcmask 125952   ;;  %s365_s1 = inlined_call_operand.vmem [shape: bf16[8,16], index: 1, kind: input, shape index: {}]   ;;  %s366_s0 = inlined_call_operand.vmem [shape: bf16[128,8], index: 0, kind: input, shape index: {}]   ;;  %s367_s2 = inlined_call_operand.vmem [shape: f32[1,16], index: 2, kind: input, shape index: {}]   ;;  %s368_s3 = inlined_call_operand.vmem [shape: bf16[128,16], index: 3, kind: output, shape index: {}]  }
   0x1   :  { %v31_v0 = vld [vmem:[%s365_s1] sm:$0xf]  ;;  %v233_v3 = vld [vmem:[%s366_s0 + $0x10] sm:$0xff]  ;;  %v232_v6 = vld [vmem:[%s366_s0 + $0x8] sm:$0xff] }
   0x2   :  { %v103_v1 = vsel %vm101_vm0, %v31_v0, 0  ;;  %v231_v2 = vld [vmem:[%s366_s0] sm:$0xff]  ;;  %v237_v5 = vld [vmem:[%s366_s0 + $0x30] sm:$0xff]  ;;  %v234_v7 = vld [vmem:[%s366_s0 + $0x18] sm:$0xff] }
   0x3   :  { %112 = vmatpush.bf16.msra.mxu0 %v103_v1  ;;  %239 = vmatpush.bf16.msra.mxu1 %v103_v1  ;;  %v235_v4 = vld [vmem:[%s366_s0 + $0x20] sm:$0xff]  ;;  %v236_v8 = vld [vmem:[%s366_s0 + $0x28] sm:$0xff]  ;;  %v238_v9 = vld [vmem:[%s366_s0 + $0x38] sm:$0xff] }
   0x4   :  { %240 = vmatpush.bf16.msra.mxu2 %v103_v1  ;;  %241 = vmatpush.bf16.msra.mxu3 %v103_v1  ;;  %v242_v10 = vld [vmem:[%s367_s2] ss:$0 sm:$0xff] }
   0x6   :  { %223 = vmatmul.msk.bf16.vlgmr.msra.gmra.mxu0 %vm76_vm1, %v231_v2  ;;  %225 = vmatmul.msk.bf16.vlgmr.msra.gmra.mxu1 %vm76_vm1, %v233_v3 }
   0x7   :  { %227 = vmatmul.msk.bf16.vlgmr.msra.gmra.mxu2 %vm76_vm1, %v235_v4  ;;  %229 = vmatmul.msk.bf16.vlgmr.msra.gmra.mxu3 %vm76_vm1, %v237_v5 }
  0x16   :  { %224 = vmatmul.msk.bf16.gmra.mxu0 %vm76_vm1, %v232_v6  ;;  %226 = vmatmul.msk.bf16.gmra.mxu1 %vm76_vm1, %v234_v7 }
  0x17   :  { %228 = vmatmul.msk.bf16.gmra.mxu2 %vm76_vm1, %v236_v8  ;;  %230 = vmatmul.msk.bf16.gmra.mxu3 %vm76_vm1, %v238_v9 }
  0x83   :  { %v114_v11 = vpop.f32.mrf.mxu0  ;;  %v124_v12 = vpop.f32.mrf.mxu1 }
  0x84   :  { %v115_v13 = vadd.f32 %v242_v10, %v114_v11  ;;  %v125_v14 = vadd.f32 %v242_v10, %v124_v12 }
  0x86   :  { %v154_v15 = vpack.c.bf16 %v115_v13, %v115_v13  ;;  %v158_v16 = vpack.c.bf16 %v125_v14, %v125_v14 }
  0x88   :  { %171 = vst.msk [vmem:[%s368_s3] sm:$0xf] %vm170_vm2, %v154_v15 }
  0x89   :  { %175 = vst.msk [vmem:[%s368_s3 + $0x10] sm:$0xf] %vm170_vm2, %v158_v16 }
  0x8a   :  { %v134_v17 = vpop.f32.mrf.mxu2  ;;  %v144_v18 = vpop.f32.mrf.mxu3 }
  0x8b   :  { %v135_v19 = vadd.f32 %v242_v10, %v134_v17  ;;  %v145_v20 = vadd.f32 %v242_v10, %v144_v18  ;;  %v116_v21 = vpop.f32.mrf.mxu0  ;;  %v126_v22 = vpop.f32.mrf.mxu1 }
  0x8c   :  { %v117_v23 = vadd.f32 %v242_v10, %v116_v21  ;;  %v127_v24 = vadd.f32 %v242_v10, %v126_v22 }
  0x8d   :  { %v162_v25 = vpack.c.bf16 %v135_v19, %v135_v19  ;;  %v166_v26 = vpack.c.bf16 %v145_v20, %v145_v20 }
  0x8e   :  { %v155_v27 = vpack.c.bf16 %v117_v23, %v117_v23  ;;  %v159_v28 = vpack.c.bf16 %v127_v24, %v127_v24 }
  0x8f   :  { %179 = vst.msk [vmem:[%s368_s3 + $0x20] sm:$0xf] %vm170_vm2, %v162_v25 }
  0x90   :  { %183 = vst.msk [vmem:[%s368_s3 + $0x30] sm:$0xf] %vm170_vm2, %v166_v26 }
  0x91   :  { %172 = vst.msk [vmem:[%s368_s3 + $0x4] sm:$0xf] %vm170_vm2, %v155_v27 }
  0x92   :  { %176 = vst.msk [vmem:[%s368_s3 + $0x14] sm:$0xf] %vm170_vm2, %v159_v28  ;;  %v136_v29 = vpop.f32.mrf.mxu2  ;;  %v146_v30 = vpop.f32.mrf.mxu3 }
  0x93   :  { %v137_v31 = vadd.f32 %v242_v10, %v136_v29  ;;  %v147_v32 = vadd.f32 %v242_v10, %v146_v30  ;;  %v119_v33 = vpop.f32.mrf.mxu0  ;;  %v129_v34 = vpop.f32.mrf.mxu1 }
  0x94   :  { %v120_v35 = vadd.f32 %v242_v10, %v119_v33  ;;  %v130_v36 = vadd.f32 %v242_v10, %v129_v34 }
  0x95   :  { %v163_v37 = vpack.c.bf16 %v137_v31, %v137_v31  ;;  %v167_v38 = vpack.c.bf16 %v147_v32, %v147_v32 }
  0x96   :  { %v156_v39 = vpack.c.bf16 %v120_v35, %v120_v35  ;;  %v160_v40 = vpack.c.bf16 %v130_v36, %v130_v36 }
  0x97   :  { %180 = vst.msk [vmem:[%s368_s3 + $0x24] sm:$0xf] %vm170_vm2, %v163_v37 }
  0x98   :  { %184 = vst.msk [vmem:[%s368_s3 + $0x34] sm:$0xf] %vm170_vm2, %v167_v38 }
  0x99   :  { %173 = vst.msk [vmem:[%s368_s3 + $0x8] sm:$0xf] %vm170_vm2, %v156_v39 }
  0x9a   :  { %177 = vst.msk [vmem:[%s368_s3 + $0x18] sm:$0xf] %vm170_vm2, %v160_v40  ;;  %v139_v41 = vpop.f32.mrf.mxu2  ;;  %v149_v42 = vpop.f32.mrf.mxu3 }
  0x9b   :  { %v140_v43 = vadd.f32 %v242_v10, %v139_v41  ;;  %v150_v44 = vadd.f32 %v242_v10, %v149_v42  ;;  %v121_v45 = vpop.f32.mrf.mxu0  ;;  %v131_v46 = vpop.f32.mrf.mxu1 }
  0x9c   :  { %v122_v47 = vadd.f32 %v242_v10, %v121_v45  ;;  %v132_v48 = vadd.f32 %v242_v10, %v131_v46 }
  0x9d   :  { %v164_v49 = vpack.c.bf16 %v140_v43, %v140_v43  ;;  %v168_v50 = vpack.c.bf16 %v150_v44, %v150_v44 }
  0x9e   :  { %v157_v51 = vpack.c.bf16 %v122_v47, %v122_v47  ;;  %v161_v52 = vpack.c.bf16 %v132_v48, %v132_v48 }
  0x9f   :  { %181 = vst.msk [vmem:[%s368_s3 + $0x28] sm:$0xf] %vm170_vm2, %v164_v49 }
  0xa0   :  { %185 = vst.msk [vmem:[%s368_s3 + $0x38] sm:$0xf] %vm170_vm2, %v168_v50 }
  0xa1   :  { %174 = vst.msk [vmem:[%s368_s3 + $0xc] sm:$0xf] %vm170_vm2, %v157_v51 }
  0xa2   :  { %178 = vst.msk [vmem:[%s368_s3 + $0x1c] sm:$0xf] %vm170_vm2, %v161_v52  ;;  %v141_v53 = vpop.f32.mrf.mxu2  ;;  %v151_v54 = vpop.f32.mrf.mxu3 }
  0xa3   :  { %v142_v55 = vadd.f32 %v242_v10, %v141_v53  ;;  %v152_v56 = vadd.f32 %v242_v10, %v151_v54 }
  0xa5   :  { %v165_v57 = vpack.c.bf16 %v142_v55, %v142_v55  ;;  %v169_v58 = vpack.c.bf16 %v152_v56, %v152_v56 }
  0xa7   :  { %182 = vst.msk [vmem:[%s368_s3 + $0x2c] sm:$0xf] %vm170_vm2, %v165_v57 }
  0xa8   :  { %186 = vst.msk [vmem:[%s368_s3 + $0x3c] sm:$0xf] %vm170_vm2, %v169_v58 }

</bundles_post_ra>
